<compile_context>
chip_gen: v5e
topology: v5e:2x2
jax: 0.10.0
libtpu: 0.0.40
codegen_flags: <defaults>
</compile_context>

<pallas_src>
from functools import partial

import numpy as np
import jax
import jax.numpy as jnp
from jax import lax
from jax.experimental import pallas as pl
from jax.experimental.pallas import tpu as pltpu


# ----------------------------------------------------------------------------
# Pallas kernels
# ----------------------------------------------------------------------------
def _mask_xw_kernel(x_ref, tmask_ref, nmask_ref, nsrc_ref, token_ref, w1_ref,
                    o_ref):
    # fused encoding_mask_noise + first feature matmul:
    #   masked = x ; masked[token]=enc_mask_token ; masked[noise]=x[chosen]
    #   out    = masked @ W1            (stored bf16 for the A_hat matmul)
    x = x_ref[...]
    t = tmask_ref[...]                  # (tm, 1) 1.0 where token node
    n = nmask_ref[...]                  # (tm, 1) 1.0 where noise node
    masked = t * token_ref[...] + n * nsrc_ref[...] + (1.0 - t - n) * x
    o_ref[...] = jnp.dot(masked, w1_ref[...],
                         preferred_element_type=jnp.float32).astype(o_ref.dtype)


def mask_xw(x, tmask, nmask, nsrc, token, w1, *, tile_n):
    n_pad, d_pad = x.shape
    h_pad = w1.shape[1]
    return pl.pallas_call(
        _mask_xw_kernel,
        out_shape=jax.ShapeDtypeStruct((n_pad, h_pad), jnp.bfloat16),
        grid=(n_pad // tile_n,),
        in_specs=[
            pl.BlockSpec((tile_n, d_pad), lambda i: (i, 0)),
            pl.BlockSpec((tile_n, 1), lambda i: (i, 0)),
            pl.BlockSpec((tile_n, 1), lambda i: (i, 0)),
            pl.BlockSpec((tile_n, d_pad), lambda i: (i, 0)),
            pl.BlockSpec((1, d_pad), lambda i: (0, 0)),
            pl.BlockSpec((d_pad, h_pad), lambda i: (0, 0)),
        ],
        out_specs=pl.BlockSpec((tile_n, h_pad), lambda i: (i, 0)),
        compiler_params=pltpu.CompilerParams(
            dimension_semantics=("parallel",)),
    )(x, tmask, nmask, nsrc, token, w1)


def _gcn_agg_proj_kernel(a_ref, xw_ref, b_ref, w_next_ref, o_ref, acc_ref):
    # out_tile = relu( sum_k A[i,k] @ XW[k] + b ) @ W_next
    k = pl.program_id(1)

    @pl.when(k == 0)
    def _():
        acc_ref[...] = jnp.zeros_like(acc_ref)

    acc_ref[...] += jnp.dot(a_ref[...], xw_ref[...],
                            preferred_element_type=jnp.float32)

    @pl.when(k == pl.num_programs(1) - 1)
    def _():
        h = jnp.maximum(acc_ref[...] + b_ref[...], 0.0)
        o_ref[...] = jnp.dot(h.astype(jnp.bfloat16), w_next_ref[...],
                             preferred_element_type=jnp.float32
                             ).astype(o_ref.dtype)


def gcn_agg_proj(a_hat, xw, b, w_next, *, tile_n):
    n_pad = a_hat.shape[0]
    h_pad = xw.shape[1]
    h_out = w_next.shape[1]
    return pl.pallas_call(
        _gcn_agg_proj_kernel,
        out_shape=jax.ShapeDtypeStruct((n_pad, h_out), jnp.bfloat16),
        grid=(n_pad // tile_n, n_pad // tile_n),
        in_specs=[
            pl.BlockSpec((tile_n, tile_n), lambda i, k: (i, k)),
            pl.BlockSpec((tile_n, h_pad), lambda i, k: (k, 0)),
            pl.BlockSpec((1, h_pad), lambda i, k: (0, 0)),
            pl.BlockSpec((h_pad, h_out), lambda i, k: (0, 0)),
        ],
        out_specs=pl.BlockSpec((tile_n, h_out), lambda i, k: (i, 0)),
        scratch_shapes=[pltpu.VMEM((tile_n, h_pad), jnp.float32)],
        compiler_params=pltpu.CompilerParams(
            dimension_semantics=("parallel", "arbitrary")),
    )(a_hat, xw, b, w_next)


def _gcn_dec_loss_kernel(a_ref, hw_ref, b_ref, weff_ref, bdec_ref,
                         x_ref, lmask_ref, o_ref, acc_ref, *, alpha):
    # enc   = relu( sum_k A[i,k] @ HW2[k] + b2 )
    # recon = enc @ (W_e2d @ W_dec) + b_dec
    # out   = sum over masked rows of (1 - cos(recon, x))**alpha   (partial)
    k = pl.program_id(1)

    @pl.when(k == 0)
    def _():
        acc_ref[...] = jnp.zeros_like(acc_ref)

    acc_ref[...] += jnp.dot(a_ref[...], hw_ref[...],
                            preferred_element_type=jnp.float32)

    @pl.when(k == pl.num_programs(1) - 1)
    def _():
        enc = jnp.maximum(acc_ref[...] + b_ref[...], 0.0)
        recon = jnp.dot(enc, weff_ref[...],
                        preferred_element_type=jnp.float32) + bdec_ref[...]
        x = x_ref[...]
        rn = recon / jnp.maximum(
            jnp.sqrt(jnp.sum(recon * recon, axis=-1, keepdims=True)), 1e-12)
        xn = x / jnp.maximum(
            jnp.sqrt(jnp.sum(x * x, axis=-1, keepdims=True)), 1e-12)
        cos = jnp.sum(rn * xn, axis=-1, keepdims=True)
        d = 1.0 - cos
        if float(alpha).is_integer():
            per = lax.integer_pow(d, int(alpha))
        else:
            per = jnp.power(d, alpha)
        part = jnp.sum(lmask_ref[...] * per)          # masked partial sum
        r = lax.broadcasted_iota(jnp.int32, (1, 8, 128), 1)
        c = lax.broadcasted_iota(jnp.int32, (1, 8, 128), 2)
        o_ref[...] = jnp.where((r == 0) & (c == 0), part, 0.0)


def gcn_dec_loss(a_hat, hw, b, w_eff, b_dec, x, loss_mask, *, tile_n, alpha):
    n_pad = a_hat.shape[0]
    h_pad = hw.shape[1]
    d_pad = w_eff.shape[1]
    n_rows = n_pad // tile_n
    partials = pl.pallas_call(
        partial(_gcn_dec_loss_kernel, alpha=alpha),
        out_shape=jax.ShapeDtypeStruct((n_rows, 8, 128), jnp.float32),
        grid=(n_rows, n_pad // tile_n),
        in_specs=[
            pl.BlockSpec((tile_n, tile_n), lambda i, k: (i, k)),
            pl.BlockSpec((tile_n, h_pad), lambda i, k: (k, 0)),
            pl.BlockSpec((1, h_pad), lambda i, k: (0, 0)),
            pl.BlockSpec((h_pad, d_pad), lambda i, k: (0, 0)),
            pl.BlockSpec((1, d_pad), lambda i, k: (0, 0)),
            pl.BlockSpec((tile_n, d_pad), lambda i, k: (i, 0)),
            pl.BlockSpec((tile_n, 1), lambda i, k: (i, 0)),
        ],
        out_specs=pl.BlockSpec((1, 8, 128), lambda i, k: (i, 0, 0)),
        scratch_shapes=[pltpu.VMEM((tile_n, h_pad), jnp.float32)],
        compiler_params=pltpu.CompilerParams(
            dimension_semantics=("parallel", "arbitrary")),
    )(a_hat, hw, b, w_eff, b_dec, x, loss_mask)
    return jnp.sum(partials)


# ----------------------------------------------------------------------------
# Host-side glue mirroring the PyTorch index bookkeeping (randperm / topk)
# ----------------------------------------------------------------------------
def get_mask_rate(mask_rate, epoch, max_epoch, mode):
    lambda0 = 0.05
    if mode == 'linear':
        return mask_rate * epoch / max_epoch
    if mode == 'root':
        return mask_rate * np.sqrt(epoch / max_epoch)
    if mode == 'geometric':
        return mask_rate * np.power(2, np.log2(lambda0)
                                    - np.log2(lambda0) * epoch / max_epoch)
    if mode == 'None':
        return mask_rate
    raise Exception('curMode error!')


def topk_np(x, ratio, batch):
    # numpy transcription of torch_geometric topk (ratio path)
    num_nodes = np.bincount(batch)
    batch_size, max_n = num_nodes.shape[0], int(num_nodes.max())
    cum = np.concatenate([[0], np.cumsum(num_nodes)[:-1]])
    index = np.arange(batch.shape[0]) - cum[batch] + batch * max_n
    dense_x = np.full(batch_size * max_n, -60000.0, dtype=np.float64)
    dense_x[index] = x
    dense_x = dense_x.reshape(batch_size, max_n)
    perm = np.argsort(-dense_x, axis=-1, kind='stable')
    perm = (perm + cum.reshape(-1, 1)).reshape(-1)
    if ratio >= 1:
        k = np.minimum(np.full(batch_size, int(ratio), dtype=np.int64), num_nodes)
    else:
        k = np.ceil(float(ratio) * num_nodes.astype(np.float64)).astype(np.int64)
    index = np.concatenate([np.arange(k[i]) + i * max_n for i in range(batch_size)])
    return perm[index]


def encoding_mask_noise_host(x_np, mask_rate, batch, scores, epoch, max_epoch,
                             cur_mode, replace_rate, alpha, rng):
    num_nodes = x_np.shape[0]
    mask_token_rate = 1.0 - replace_rate
    tmp_mask_rate = get_mask_rate(mask_rate, epoch, max_epoch, cur_mode)
    throw_nodes_first = topk_np(scores, tmp_mask_rate, batch)
    tmp_scores = rng.uniform(0.0, 1.0, num_nodes)
    tmp_scores[throw_nodes_first] += alpha
    keep_nodes = topk_np(-tmp_scores, 1.0 - mask_rate, batch)
    all_idx = np.arange(num_nodes)
    mask_nodes = np.setdiff1d(all_idx, keep_nodes)

    n_mask = len(mask_nodes)
    token_mask = np.zeros((num_nodes, 1), dtype=np.float32)
    noise_mask = np.zeros((num_nodes, 1), dtype=np.float32)
    noise_src = np.zeros_like(x_np)
    if replace_rate > 0:
        num_noise = int(replace_rate * n_mask)
        perm_mask = rng.permutation(n_mask)
        token_nodes = mask_nodes[perm_mask[:int(mask_token_rate * n_mask)]]
        noise_nodes = (mask_nodes[perm_mask[n_mask - num_noise:]]
                       if num_noise > 0 else np.array([], dtype=np.int64))
        noise_chosen = rng.permutation(num_nodes)[:num_noise]
        token_mask[token_nodes] = 1.0
        if num_noise > 0:
            noise_mask[noise_nodes] = 1.0
            noise_src[noise_nodes] = x_np[noise_chosen]
    else:
        token_nodes = mask_nodes
        token_mask[token_nodes] = 1.0
    return token_mask, noise_mask, noise_src, mask_nodes, keep_nodes


# ----------------------------------------------------------------------------
# Device-side helpers
# ----------------------------------------------------------------------------
def build_norm_adj_device(edge_index, n, n_pad):
    # symmetric-normalized adjacency with self-loops: D^-1/2 (A + I) D^-1/2
    # built directly on device at padded size, cast to bf16.
    src = jnp.asarray(edge_index[0], jnp.int32)
    dst = jnp.asarray(edge_index[1], jnp.int32)
    a = jnp.zeros((n_pad, n_pad), jnp.float32)
    a = a.at[src, dst].set(1.0)
    a = a.at[dst, src].set(1.0)
    diag = jnp.arange(n)
    a = a.at[diag, diag].add(1.0)
    deg = jnp.sum(a, axis=1)
    d_inv_sqrt = jnp.where(deg > 0.0, lax.rsqrt(jnp.maximum(deg, 1e-12)), 0.0)
    return (a * d_inv_sqrt[:, None] * d_inv_sqrt[None, :]).astype(jnp.bfloat16)


def _round_up(v, m):
    return ((v + m - 1) // m) * m


def _pad2(a, r, c):
    a = jnp.asarray(a, jnp.float32)
    return jnp.zeros((r, c), jnp.float32).at[:a.shape[0], :a.shape[1]].set(a)


# ----------------------------------------------------------------------------
# PreModel forward (mask_attr_prediction)
# ----------------------------------------------------------------------------
def premodel_forward(x, edge_index, batch, pr, params, *,
                     mask_rate=0.3, replace_rate=0.1, alpha=0.0, alpha_l=2.0,
                     epoch=5, max_epoch=10, cur_mode='linear', rng=None,
                     tile_n=256):
    # tile_n: A_hat tile edge. 256 aligns with the v6e/v7x 2x256 MXU; use 512
    # (and bigger) for large N; it must be a multiple of 128 (v5e MXU / vreg).
    x_np = np.asarray(x, dtype=np.float32)
    n, in_dim = x_np.shape
    num_hidden = params['W_enc1'].shape[1]

    tile_n = max(128, tile_n)
    n_pad = _round_up(n, tile_n)
    d_pad = _round_up(in_dim, 128)       # lane-dense feature dims
    h_pad = _round_up(num_hidden, 128)

    # host-side index bookkeeping (mirrors the torch randperm/topk logic)
    token_mask, noise_mask, noise_src, mask_nodes, _ = encoding_mask_noise_host(
        x_np, mask_rate, batch, pr, epoch, max_epoch, cur_mode,
        replace_rate, alpha, rng)
    n_mask = len(mask_nodes)
    loss_mask = np.zeros((n, 1), dtype=np.float32)
    loss_mask[mask_nodes] = 1.0

    # padded device arrays (zero padding keeps all math exact for real lanes)
    x_d = _pad2(x_np, n_pad, d_pad)
    tmask_d = _pad2(token_mask, n_pad, 1)
    nmask_d = _pad2(noise_mask, n_pad, 1)
    nsrc_d = _pad2(noise_src, n_pad, d_pad)
    lmask_d = _pad2(loss_mask, n_pad, 1)
    token_d = _pad2(params['enc_mask_token'], 1, d_pad)

    w1 = _pad2(params['W_enc1'], d_pad, h_pad)
    b1 = _pad2(params['b_enc1'], 1, h_pad)
    w2 = _pad2(params['W_enc2'], h_pad, h_pad).astype(jnp.bfloat16)
    b2 = _pad2(params['b_enc2'], 1, h_pad)
    # encoder_to_decoder (bias-free) + linear decoder fold into one matmul;
    # padded columns of W_dec / b_dec are zero, so padded recon lanes stay 0.
    w_eff = jnp.dot(_pad2(params['W_e2d'], h_pad, h_pad),
                    _pad2(params['W_dec'], h_pad, d_pad),
                    preferred_element_type=jnp.float32)
    b_dec = _pad2(params['b_dec'], 1, d_pad)

    a_hat = build_norm_adj_device(edge_index, n, n_pad)

    # fused Pallas pipeline:
    #   K1: masked-x @ W1              K2: relu(A@XW1+b1) @ W2
    #   K3: relu(A@HW2+b2) @ W_eff + b_dec -> masked SCE partial sums
    xw1 = mask_xw(x_d, tmask_d, nmask_d, nsrc_d, token_d, w1, tile_n=tile_n)
    hw2 = gcn_agg_proj(a_hat, xw1, b1, w2, tile_n=tile_n)
    loss_sum = gcn_dec_loss(a_hat, hw2, b2, w_eff, b_dec, x_d, lmask_d,
                            tile_n=tile_n, alpha=alpha_l)
    return loss_sum / float(n_mask)


# ----------------------------------------------------------------------------
if __name__ == "__main__":
    # small synthetic problem: 2 ring graphs x 160 nodes, in_dim=16, hidden=32.
    # N=320 with tile_n=256 pads to 512 -> 2x2 tiled A_hat grid, exercising the
    # multi-tile reduction / accumulator path.
    n_per, n_graphs = 160, 2
    n_nodes = n_per * n_graphs
    in_dim, num_hidden = 16, 32

    key = jax.random.PRNGKey(0)
    ks = jax.random.split(key, 8)

    x = jax.random.normal(ks[0], (n_nodes, in_dim), dtype=jnp.float32)
    pr = np.asarray(jax.random.uniform(ks[1], (n_nodes,)), dtype=np.float64)
    batch = np.repeat(np.arange(n_graphs), n_per)

    # ring graph per batch element
    src, dst = [], []
    for g in range(n_graphs):
        base = g * n_per
        for i in range(n_per):
            src.append(base + i)
            dst.append(base + (i + 1) % n_per)
    edge_index = np.stack([np.array(src), np.array(dst)])

    # deterministic parameter init (shapes follow PreModel.__init__)
    scale = 0.1
    params = {
        'W_enc1': scale * jax.random.normal(ks[2], (in_dim, num_hidden), jnp.float32),
        'b_enc1': jnp.zeros((1, num_hidden), jnp.float32),
        'W_enc2': scale * jax.random.normal(ks[3], (num_hidden, num_hidden), jnp.float32),
        'b_enc2': jnp.zeros((1, num_hidden), jnp.float32),
        'W_e2d': scale * jax.random.normal(ks[4], (num_hidden, num_hidden), jnp.float32),
        'W_dec': scale * jax.random.normal(ks[5], (num_hidden, in_dim), jnp.float32),
        'b_dec': jnp.zeros((1, in_dim), jnp.float32),
        'enc_mask_token': jnp.zeros((1, in_dim), jnp.float32),  # zeros, as in nn.Parameter init
    }

    rng = np.random.default_rng(0)
    loss = premodel_forward(x, edge_index, batch, pr, params,
                            mask_rate=0.3, replace_rate=0.1, alpha=0.0,
                            alpha_l=2.0, epoch=5, max_epoch=10,
                            cur_mode='linear', rng=rng, tile_n=256)
    jax.block_until_ready(loss)
    assert np.isfinite(np.asarray(loss)), "loss is not finite"
    print("KERNEL_OK")
</pallas_src>

<mosaic_0001>
module attributes {stable_mosaic.version = 11 : i64} {
  func.func @_mask_xw_kernel(%arg0: i32, %arg1: memref<256x128xf32, #tpu.memory_space<vmem>>, %arg2: memref<256x1xf32, #tpu.memory_space<vmem>>, %arg3: memref<256x1xf32, #tpu.memory_space<vmem>>, %arg4: memref<256x128xf32, #tpu.memory_space<vmem>>, %arg5: memref<1x128xf32, #tpu.memory_space<vmem>>, %arg6: memref<128x128xf32, #tpu.memory_space<vmem>>, %arg7: memref<256x128xbf16, #tpu.memory_space<vmem>>) attributes {dimension_semantics = [#tpu.dimension_semantics<parallel>], iteration_bounds = array<i64: 2>, scalar_prefetch = 0 : i64, scratch_operands = 0 : i64, tpu.core_type = #tpu.core_type<tc>, window_params = [{transform_indices = @transform_0, window_bounds = array<i64: 256, 128>}, {transform_indices = @transform_1, window_bounds = array<i64: 256, 1>}, {transform_indices = @transform_2, window_bounds = array<i64: 256, 1>}, {transform_indices = @transform_3, window_bounds = array<i64: 256, 128>}, {pipeline_mode = #tpu.pipeline_mode<synchronous>, transform_indices = @transform_4, window_bounds = array<i64: 1, 128>}, {pipeline_mode = #tpu.pipeline_mode<synchronous>, transform_indices = @transform_5, window_bounds = array<i64: 128, 128>}, {transform_indices = @transform_6, window_bounds = array<i64: 256, 128>}]} {
    %c0 = arith.constant 0 : index
    %c0_0 = arith.constant 0 : index
    %0 = vector.load %arg1[%c0, %c0_0] : memref<256x128xf32, #tpu.memory_space<vmem>>, vector<256x128xf32>
    %c0_1 = arith.constant 0 : index
    %c0_2 = arith.constant 0 : index
    %1 = vector.load %arg2[%c0_1, %c0_2] : memref<256x1xf32, #tpu.memory_space<vmem>>, vector<256x1xf32>
    %c0_3 = arith.constant 0 : index
    %c0_4 = arith.constant 0 : index
    %2 = vector.load %arg3[%c0_3, %c0_4] : memref<256x1xf32, #tpu.memory_space<vmem>>, vector<256x1xf32>
    %c0_5 = arith.constant 0 : index
    %c0_6 = arith.constant 0 : index
    %3 = vector.load %arg5[%c0_5, %c0_6] : memref<1x128xf32, #tpu.memory_space<vmem>>, vector<1x128xf32>
    %4 = vector.broadcast %1 : vector<256x1xf32> to vector<256x128xf32>
    %5 = vector.broadcast %3 : vector<1x128xf32> to vector<256x128xf32>
    %6 = arith.mulf %4, %5 : vector<256x128xf32>
    %c0_7 = arith.constant 0 : index
    %c0_8 = arith.constant 0 : index
    %7 = vector.load %arg4[%c0_7, %c0_8] : memref<256x128xf32, #tpu.memory_space<vmem>>, vector<256x128xf32>
    %8 = vector.broadcast %2 : vector<256x1xf32> to vector<256x128xf32>
    %9 = arith.mulf %8, %7 : vector<256x128xf32>
    %10 = arith.addf %6, %9 : vector<256x128xf32>
    %cst = arith.constant 1.000000e+00 : f32
    %11 = vector.broadcast %cst : f32 to vector<256x1xf32>
    %12 = arith.subf %11, %1 : vector<256x1xf32>
    %13 = arith.subf %12, %2 : vector<256x1xf32>
    %14 = vector.broadcast %13 : vector<256x1xf32> to vector<256x128xf32>
    %15 = arith.mulf %14, %0 : vector<256x128xf32>
    %16 = arith.addf %10, %15 : vector<256x128xf32>
    %c0_9 = arith.constant 0 : index
    %c0_10 = arith.constant 0 : index
    %17 = vector.load %arg6[%c0_9, %c0_10] : memref<128x128xf32, #tpu.memory_space<vmem>>, vector<128x128xf32>
    %cst_11 = arith.constant dense<0.000000e+00> : vector<256x128xf32>
    %18 = tpu.matmul %16, %17, %cst_11 {dimension_numbers = #tpu.dot_dimension_numbers<[1], [0], [0], [1], [0, 0, 1, 1], [], []>} : vector<256x128xf32>, vector<128x128xf32>, vector<256x128xf32> -> vector<256x128xf32>
    %19 = arith.truncf %18 : vector<256x128xf32> to vector<256x128xbf16>
    %c0_12 = arith.constant 0 : index
    %c0_13 = arith.constant 0 : index
    %20 = vector.load %arg7[%c0_12, %c0_13] : memref<256x128xbf16, #tpu.memory_space<vmem>>, vector<256x128xbf16>
    tpu.vector_store %arg7[%c0_12, %c0_13], %19 {strides = array<i32>} : memref<256x128xbf16, #tpu.memory_space<vmem>>, vector<256x128xbf16>,
    return
  }
  func.func @transform_0(%arg0: i32) -> (i32, i32) {
    %c0_i32 = arith.constant 0 : i32
    %c0_i32_0 = arith.constant 0 : i32
    return %arg0, %c0_i32 : i32, i32
  }
  func.func @transform_1(%arg0: i32) -> (i32, i32) {
    %c0_i32 = arith.constant 0 : i32
    %c0_i32_0 = arith.constant 0 : i32
    return %arg0, %c0_i32 : i32, i32
  }
  func.func @transform_2(%arg0: i32) -> (i32, i32) {
    %c0_i32 = arith.constant 0 : i32
    %c0_i32_0 = arith.constant 0 : i32
    return %arg0, %c0_i32 : i32, i32
  }
  func.func @transform_3(%arg0: i32) -> (i32, i32) {
    %c0_i32 = arith.constant 0 : i32
    %c0_i32_0 = arith.constant 0 : i32
    return %arg0, %c0_i32 : i32, i32
  }
  func.func @transform_4(%arg0: i32) -> (i32, i32) {
    %c0_i32 = arith.constant 0 : i32
    %c0_i32_0 = arith.constant 0 : i32
    %c0_i32_1 = arith.constant 0 : i32
    return %c0_i32, %c0_i32_0 : i32, i32
  }
  func.func @transform_5(%arg0: i32) -> (i32, i32) {
    %c0_i32 = arith.constant 0 : i32
    %c0_i32_0 = arith.constant 0 : i32
    %c0_i32_1 = arith.constant 0 : i32
    return %c0_i32, %c0_i32_0 : i32, i32
  }
  func.func @transform_6(%arg0: i32) -> (i32, i32) {
    %c0_i32 = arith.constant 0 : i32
    %c0_i32_0 = arith.constant 0 : i32
    return %arg0, %c0_i32 : i32, i32
  }
}

</mosaic_0001>

<bundles_post_ra>
// kernel: tpu_custom_call.1
= control target key start
LH: loop header
LB: loop body
LE: loop exit
PB: predicated region body
PF: predicated region fallthrough
CT: control target
= control target key end

     0   :  { %11 = vsyncpa [#allocation3], 0  ;;  %s2495_s0 = inlined_call_operand.vmem [shape: f32[512,128], index: 0, kind: input, shape index: {}]   ;;  %s2496_s1 = inlined_call_operand.vmem [shape: f32[512,1], index: 1, kind: input, shape index: {}]   ;;  %s2497_s2 = inlined_call_operand.vmem [shape: f32[512,1], index: 2, kind: input, shape index: {}]   ;;  %s2498_s3 = inlined_call_operand.vmem [shape: f32[512,128], index: 3, kind: input, shape index: {}]   ;;  %s2499_s4 = inlined_call_operand.vmem [shape: f32[1,128], index: 4, kind: input, shape index: {}]   ;;  %s2500_s5 = inlined_call_operand.hbm [shape: f32[128,128], index: 5, kind: input, shape index: {}]   ;;  %s2501_s6 = inlined_call_operand.hbm [shape: bf16[512,128], index: 6, kind: output, shape index: {}]  }
   0x1   :  { %12 = vsyncpa [#allocation4], 0 }
   0x2   :  { %14 = vsyncpa [#allocation4 + $0x1], 0  ;;  %s1853_s21 = smov 0   ;;  %s1855_s22 = smov 0  }
   0x3   :  { %s1857_s23 = smov 0   ;;  %s1859_s24 = smov 0  }
   0x4 LB: > { %s1874_s25 = sadd.s32 4294967295, %s1810_s24   ;;  %s1491_s26 = sadd.s32 4294967294, %s1810_s24   ;;  %s1810_s24 = sphi %s1859_s24, %s2513_s24   ;;  %s1806_s23 = sphi %s1857_s23, %s2512_s23   ;;  %s1802_s22 = sphi %s1855_s22, %s2511_s22   ;;  %s1798_s21 = sphi %s1853_s21, %s2510_s21  }
   0x5   : > { %s1878_s27 = sadd.s32 1, %s1810_s24   ;;  %s173_s28 = sadd.s32 1, %s1806_s23 }
   0x6   : > { %s170_s29 = ssub.s32 %s1810_s24, %s1878_s27  ;;  %p183_p0 = scmp.ne.s32.totalorder %s1806_s23, %s1802_s22 }
   0x7   : > { %p171_p1 = scmp.eq.s32.totalorder %s170_s29, 0  ;;  %p184_p2 = scmp.eq.s32.totalorder %s1874_s25, 1 }
   0x8   : > { %p189_p3 = scmp.ne.s32.totalorder %s1802_s22, %s1798_s21  ;;  %p190_p4 = scmp.eq.s32.totalorder %s1491_s26, 1 }
   0x9   : > { %s1889_s30 = scalar_select %p171_p1, %s1806_s23, %s173_s28  }
   0xa   : > { %p1891_p5 = por %p184_p2, %p183_p0  ;;  %p1895_p6 = por %p190_p4, %p189_p3 }
   0xb   : > { %p1492_p7 = scmp.ge.s32.totalorder %s1810_s24, 1  ;;  %p197_p8 = scmp.lt.s32.totalorder %s1810_s24, 3 }
   0xc   : > { %p1669_p9 = scmp.eq.s32.totalorder %s1874_s25, 0  ;;  %s211_s11 = sshll.u32 %s2500_s5, 4  ;;  %s212_s11 = int_to_ptr.hbm [resolvable:$true] %s211_s11 }
   0xd   : > { %p198_p10 = pnand %p1492_p7, %p197_p8  ;;  %s1812_s12 = smov [#allocation2]  }
   0xe   : > { %s213_s13 = sshll.u32 %s1812_s12, 4  ;;  %s1813_s14 = smov 128   ;;  %s214_s13 = int_to_ptr.vmem [resolvable:$true] %s213_s13 }
   0xf   : > { %p1661_p11 = pneg %p198_p10  ;;  %s1814_s15 = smov 8  }
  0x10   : > { %265 = sbr.rel (%p198_p10) target bundleno = 535 (0x217), region = 44 }
  0x11   : > { %p1662_p12 = pnand %p1669_p9, %p1661_p11 }
  0x13   : > { %1664 = dma.hbm_to_vmem [thread:$0]  (!%p1662_p12), %s212_s11, 2048, %s214_s13, [#allocation3], %s1813_s14, %s1813_s14, %s1814_s15  }
  0x15   : > { %1789 = dma.done.wait (%p1669_p9), [#allocation3], 2048  }
  0x16   : > { %1791 = vsyncadd (%p1669_p9), [#allocation3], 4294965248  ;;  %s1498_s16 = sshll.u32 %s1874_s25, 5  ;;  %v1815_v0 = vmov 0   ;;  %s1764_s15 = scalar_lea.hbm %s2501_s6, 256 }
  0x17   : > { %1712 = vset.pattern.permute.xlu2 %v1815_v0  ;;  %1711 = vset.pattern.permute.xlu1 %v1815_v0  ;;  %p312_p13 = scmp.lt.s32.totalorder %s1498_s16, 63 }
  0x18   : > { %1710 = vset.pattern.permute.xlu0 %v1815_v0 }
  0x19   : > { %s2515_s16 = smov (!%p312_p13, %s1498_s16), 63 }
  0x1a   : > { %s1912_s17 = sshll.u32 %s2515_s16, 3 }
  0x1b   : > { %s1918_s20 = scalar_lea.vmem %s2496_s1, %s1912_s17  ;;  %s1978_s29 = scalar_lea.vmem %s2497_s2, %s1912_s17 }
  0x1c   : > { %v1921_v1 = vld [vmem:[%s1918_s20 + $0x20] sm:$0xff]  ;;  %v370_v2 = vld [vmem:[%s1918_s20 + $0x10] sm:$0xff]  ;;  %v1927_v4 = vld [vmem:[%s1918_s20 + $0x28] sm:$0xff]  ;;  %s2175_s11 = scalar_lea.vmem %s2498_s3, %s1912_s17  ;;  %s2340_s16 = scalar_lea.vmem %s2495_s0, %s1912_s17 }
  0x1d   : > { %v368_v3 = vld [vmem:[%s1918_s20] sm:$0xff]  ;;  %455 = vperm.xlu2 %1712, %v1921_v1   ;;  %445 = vperm.xlu1 %1711, %v370_v2   ;;  %v371_v5 = vld [vmem:[%s1918_s20 + $0x18] sm:$0xff]  ;;  %v369_v6 = vld [vmem:[%s1918_s20 + $0x8] sm:$0xff]  ;;  %v886_v26 = vsub.f32 1.0, %v370_v2  ;;  %v888_v40 = vsub.f32 1.0, %v1921_v1  ;;  %v889_v41 = vsub.f32 1.0, %v1927_v4 }
  0x1e   : > { %435 = vperm.xlu0 %1710, %v368_v3   ;;  %v1933_v7 = vld [vmem:[%s1918_s20 + $0x40] sm:$0xff]  ;;  %v1936_v8 = vld [vmem:[%s1918_s20 + $0x38] sm:$0xff]  ;;  %v374_v9 = vld [vmem:[%s1918_s20 + $0x30] sm:$0xff]  ;;  %v884_v19 = vsub.f32 1.0, %v368_v3  ;;  %v887_v25 = vsub.f32 1.0, %v371_v5  ;;  %v885_v27 = vsub.f32 1.0, %v369_v6 }
  0x1f   : > { %v1942_v10 = vld [vmem:[%s1918_s20 + $0x58] sm:$0xff]  ;;  %v1945_v11 = vld [vmem:[%s1918_s20 + $0x50] sm:$0xff]  ;;  %v377_v12 = vld [vmem:[%s1918_s20 + $0x48] sm:$0xff]  ;;  %v890_v32 = vsub.f32 1.0, %v374_v9  ;;  %v891_v52 = vsub.f32 1.0, %v1936_v8  ;;  %s308_s17 = sand.u32 1, %s1802_s22  }
  0x20   : > { %v1951_v13 = vld [vmem:[%s1918_s20 + $0x70] sm:$0xff]  ;;  %v1954_v14 = vld [vmem:[%s1918_s20 + $0x68] sm:$0xff]  ;;  %v1957_v15 = vld [vmem:[%s1918_s20 + $0x60] sm:$0xff]  ;;  %v893_v45 = vsub.f32 1.0, %v377_v12  ;;  %v895_v61 = vsub.f32 1.0, %v1942_v10  ;;  %v894_v62 = vsub.f32 1.0, %v1945_v11 }
  0x21   : > { %v1963_v16 = vld [vmem:[%s1918_s20 + $0x88] sm:$0xff]  ;;  %v1966_v17 = vld [vmem:[%s1918_s20 + $0x80] sm:$0xff]  ;;  %v1969_v18 = vld [vmem:[%s1918_s20 + $0x78] sm:$0xff]  ;;  %v896_v56 = vsub.f32 1.0, %v1957_v15  ;;  %s1497_s18 = sshll.u32 %s308_s17, 7 }
  0x22   : > { %v1981_v20 = vld [vmem:[%s1918_s20 + $0xa0] sm:$0xff]  ;;  %v1984_v21 = vld [vmem:[%s1918_s20 + $0x98] sm:$0xff]  ;;  %v1987_v22 = vld [vmem:[%s1918_s20 + $0x90] sm:$0xff]  ;;  %v899_v3 = vsub.f32 1.0, %v1969_v18  ;;  %s2443_s19 = scalar_lea.vmem [#allocation5], %s1497_s18 }
  0x23   : > { %v400_v23 = vld [vmem:[%s1978_s29] sm:$0xff]  ;;  %v1996_v28 = vld [vmem:[%s1918_s20 + $0xb8] sm:$0xff]  ;;  %v1999_v29 = vld [vmem:[%s1918_s20 + $0xb0] sm:$0xff]  ;;  %s1378_s9 = sshll.u32 %s2443_s19, 4  ;;  %s1379_s9 = int_to_ptr.vmem [resolvable:$true] %s1378_s9 }
  0x24   : > { %v1992_v24 = vsub.f32 %v884_v19, %v400_v23  ;;  %v2002_v30 = vld [vmem:[%s1918_s20 + $0xa8] sm:$0xff]  ;;  %v403_v31 = vld [vmem:[%s1978_s29 + $0x18] sm:$0xff]  ;;  %v402_v34 = vld [vmem:[%s1978_s29 + $0x10] sm:$0xff] }
  0x25   : > { %460 = vperm.xlu2 %1712, %v1927_v4   ;;  %450 = vperm.xlu1 %1711, %v371_v5   ;;  %v2007_v33 = vsub.f32 %v887_v25, %v403_v31  ;;  %v401_v35 = vld [vmem:[%s1978_s29 + $0x8] sm:$0xff]  ;;  %v2012_v36 = vsub.f32 %v886_v26, %v402_v34  ;;  %v406_v38 = vld [vmem:[%s1978_s29 + $0x30] sm:$0xff]  ;;  %v2028_v44 = vld [vmem:[%s1918_s20 + $0xc0] sm:$0xff] }
  0x26   : > { %440 = vperm.xlu0 %1710, %v369_v6   ;;  %v2014_v37 = vsub.f32 %v885_v27, %v401_v35  ;;  %v2017_v39 = vsub.f32 %v890_v32, %v406_v38  ;;  %v2022_v42 = vld [vmem:[%s1918_s20 + $0xd0] sm:$0xff]  ;;  %v2025_v43 = vld [vmem:[%s1918_s20 + $0xc8] sm:$0xff]  ;;  %v404_v47 = vld [vmem:[%s1978_s29 + $0x20] sm:$0xff]  ;;  %v906_v32 = vsub.f32 1.0, %v1999_v29 }
  0x27   : > { %v405_v46 = vld [vmem:[%s1978_s29 + $0x28] sm:$0xff]  ;;  %v2037_v49 = vsub.f32 %v888_v40, %v404_v47  ;;  %v2047_v54 = vld [vmem:[%s1918_s20 + $0xe0] sm:$0xff]  ;;  %v2050_v55 = vld [vmem:[%s1918_s20 + $0xd8] sm:$0xff] }
  0x28   : > { %v2035_v48 = vsub.f32 %v889_v41, %v405_v46  ;;  %v409_v50 = vld [vmem:[%s1978_s29 + $0x48] sm:$0xff]  ;;  %v407_v57 = vld [vmem:[%s1978_s29 + $0x38] sm:$0xff]  ;;  %v412_v59 = vld [vmem:[%s1978_s29 + $0x60] sm:$0xff] }
  0x29   : > { %v2040_v51 = vsub.f32 %v893_v45, %v409_v50  ;;  %v2044_v53 = vld [vmem:[%s1918_s20 + $0xe8] sm:$0xff]  ;;  %v2057_v58 = vsub.f32 %v891_v52, %v407_v57  ;;  %v2060_v60 = vsub.f32 %v896_v56, %v412_v59  ;;  %v2065_v63 = vld [vmem:[%s1918_s20 + $0xf8] sm:$0xff]  ;;  %v2068_v0 = vld [vmem:[%s1918_s20 + $0xf0] sm:$0xff]  ;;  %s1511_s20 = sshll.u32 %s1874_s25, 7  ;;  %s1366_s25 = scalar_lea.sflag [#allocation4], %s308_s17 }
  0x2a   : > { %v411_v1 = vld [vmem:[%s1978_s29 + $0x58] sm:$0xff]  ;;  %v410_v2 = vld [vmem:[%s1978_s29 + $0x50] sm:$0xff]  ;;  %v408_v25 = vld [vmem:[%s1978_s29 + $0x40] sm:$0xff] }
  0x2b   : > { %v2075_v4 = vsub.f32 %v895_v61, %v411_v1  ;;  %v2077_v5 = vsub.f32 %v894_v62, %v410_v2  ;;  %v415_v6 = vld [vmem:[%s1978_s29 + $0x78] sm:$0xff]  ;;  %v416_v52 = vld [vmem:[%s1978_s29 + $0x80] sm:$0xff] }
  0x2c   : > { %v2131_v61 = vld [vmem:[%s1978_s29 + $0xa0] sm:$0xff]  ;;  %v2134_v62 = vld [vmem:[%s1978_s29 + $0x98] sm:$0xff] }
  0x2d   : > { %475 = vperm.xlu2 %1712, %v1933_v7   ;;  %470 = vperm.xlu1 %1711, %v1936_v8   ;;  %v898_v8 = vsub.f32 1.0, %v1951_v13 }
  0x2e   : > { %465 = vperm.xlu0 %1710, %v374_v9   ;;  %v897_v9 = vsub.f32 1.0, %v1954_v14 }
  0x35   : > { %490 = vperm.xlu2 %1712, %v1942_v10   ;;  %485 = vperm.xlu1 %1711, %v1945_v11   ;;  %v2082_v10 = vsub.f32 %v899_v3, %v415_v6  ;;  %v414_v11 = vld [vmem:[%s1978_s29 + $0x70] sm:$0xff] }
  0x36   : > { %480 = vperm.xlu0 %1710, %v377_v12   ;;  %v413_v12 = vld [vmem:[%s1978_s29 + $0x68] sm:$0xff] }
  0x3d   : > { %505 = vperm.xlu2 %1712, %v1951_v13   ;;  %500 = vperm.xlu1 %1711, %v1954_v14   ;;  %v905_v13 = vsub.f32 1.0, %v2002_v30 }
  0x3e   : > { %495 = vperm.xlu0 %1710, %v1957_v15   ;;  %v2086_v15 = vsub.f32 %v898_v8, %v414_v11  ;;  %v908_v8 = vsub.f32 1.0, %v2028_v44 }
  0x45   : > { %520 = vperm.xlu2 %1712, %v1963_v16   ;;  %515 = vperm.xlu1 %1711, %v1966_v17  }
  0x46   : > { %510 = vperm.xlu0 %1710, %v1969_v18   ;;  %v2088_v18 = vsub.f32 %v897_v9, %v413_v12  ;;  %v900_v9 = vsub.f32 1.0, %v1966_v17 }
  0x4d   : > { %535 = vperm.xlu2 %1712, %v1981_v20   ;;  %530 = vperm.xlu1 %1711, %v1984_v21  }
  0x4e   : > { %525 = vperm.xlu0 %1710, %v1987_v22  }
  0x55   : > { %550 = vperm.xlu2 %1712, %v1996_v28   ;;  %545 = vperm.xlu1 %1711, %v1999_v29  }
  0x56   : > { %540 = vperm.xlu0 %1710, %v2002_v30   ;;  %v423_v30 = vld [vmem:[%s1978_s29 + $0xb8] sm:$0xff] }
  0x5d   : > { %565 = vperm.xlu2 %1712, %v2022_v42   ;;  %560 = vperm.xlu1 %1711, %v2025_v43  }
  0x5e   : > { %555 = vperm.xlu0 %1710, %v2028_v44  }
  0x65   : > { %580 = vperm.xlu2 %1712, %v2044_v53   ;;  %575 = vperm.xlu1 %1711, %v2047_v54  }
  0x66   : > { %570 = vperm.xlu0 %1710, %v2050_v55  }
  0x6d   : > { %662 = vperm.xlu2 %1712, %v400_v23   ;;  %590 = vperm.xlu1 %1711, %v2065_v63   ;;  %v421_v23 = vld [vmem:[%s1978_s29 + $0xa8] sm:$0xff] }
  0x6e   : > { %585 = vperm.xlu0 %1710, %v2068_v0   ;;  %v2097_v26 = vsub.f32 %v905_v13, %v421_v23 }
  0x75   : > { %677 = vperm.xlu2 %1712, %v403_v31   ;;  %672 = vperm.xlu1 %1711, %v402_v34   ;;  %v907_v31 = vsub.f32 1.0, %v1996_v28  ;;  %v422_v34 = vld [vmem:[%s1978_s29 + $0xb0] sm:$0xff] }
  0x76   : > { %667 = vperm.xlu0 %1710, %v401_v35  }
  0x77   : > { %v2090_v19 = vpop.permute.xlu2 %455  ;;  %v2105_v35 = vsub.f32 %v907_v31, %v423_v30  ;;  %v932_v31 = vsub.f32 %v900_v9, %v416_v52  ;;  %v426_v9 = vld [vmem:[%s1978_s29 + $0xd0] sm:$0xff] }
  0x7d   : > { %692 = vperm.xlu2 %1712, %v406_v38   ;;  %687 = vperm.xlu1 %1711, %v405_v46   ;;  %v2107_v38 = vsub.f32 %v906_v32, %v422_v34  ;;  %v425_v32 = vld [vmem:[%s1978_s29 + $0xc8] sm:$0xff] }
  0x7e   : > { %682 = vperm.xlu0 %1710, %v404_v47   ;;  %v418_v47 = vld [vmem:[%s1978_s29 + $0x90] sm:$0xff] }
  0x7f   : > { %v2093_v14 = vpop.permute.xlu2 %460 }
  0x85   : > { %707 = vperm.xlu2 %1712, %v409_v50   ;;  %702 = vperm.xlu1 %1711, %v408_v25   ;;  %v417_v50 = vld [vmem:[%s1978_s29 + $0x88] sm:$0xff] }
  0x86   : > { %697 = vperm.xlu0 %1710, %v407_v57  }
  0x87   : > { %v2099_v27 = vpop.permute.xlu2 %475 }
  0x88   : > { %2504 = vst [vmem:[#allocation8_spill] sm:$0xff] %v2099_v27 }
  0x8d   : > { %722 = vperm.xlu2 %1712, %v412_v59   ;;  %717 = vperm.xlu1 %1711, %v411_v1  }
  0x8e   : > { %712 = vperm.xlu0 %1710, %v410_v2  }
  0x8f   : > { %v2109_v40 = vpop.permute.xlu2 %490  ;;  %v2111_v41 = vpop.permute.xlu1 %445 }
  0x90   : > { %v2113_v45 = vpop.permute.xlu0 %435 }
  0x95   : > { %737 = vperm.xlu2 %1712, %v415_v6   ;;  %732 = vperm.xlu1 %1711, %v414_v11   ;;  %v424_v6 = vld [vmem:[%s1978_s29 + $0xc0] sm:$0xff] }
  0x96   : > { %727 = vperm.xlu0 %1710, %v413_v12  }
  0x97   : > { %v2115_v28 = vpop.permute.xlu2 %505  ;;  %v2117_v29 = vpop.permute.xlu1 %450 }
  0x98   : > { %v2119_v46 = vpop.permute.xlu0 %440 }
  0x9d   : > { %752 = vperm.xlu2 %1712, %v418_v47   ;;  %747 = vperm.xlu1 %1711, %v417_v50  }
  0x9e   : > { %742 = vperm.xlu0 %1710, %v416_v52   ;;  %v909_v52 = vsub.f32 1.0, %v2025_v43  ;;  %v2180_v43 = vld [vmem:[%s2499_s4] ss:$0 sm:$0xff] }
  0x9f   : > { %v2124_v56 = vpop.permute.xlu2 %520  ;;  %v2126_v57 = vpop.permute.xlu1 %470 }
  0xa0   : > { %2505 = vst [vmem:[#allocation9_spill] sm:$0xff] %v2124_v56  ;;  %v2128_v59 = vpop.permute.xlu0 %465  ;;  %v901_v56 = vsub.f32 1.0, %v1963_v16 }
  0xa2   : > { %v933_v27 = vsub.f32 %v901_v56, %v417_v50 }
  0xa5   : > { %767 = vperm.xlu2 %1712, %v421_v23   ;;  %762 = vperm.xlu1 %1711, %v2131_v61   ;;  %v940_v23 = vsub.f32 %v908_v8, %v424_v6  ;;  %v941_v8 = vsub.f32 %v909_v52, %v425_v32 }
  0xa6   : > { %757 = vperm.xlu0 %1710, %v2134_v62  }
  0xa7   : > { %v2138_v1 = vpop.permute.xlu2 %535  ;;  %v2140_v2 = vpop.permute.xlu1 %485 }
  0xa8   : > { %2506 = vst [vmem:[#allocation10_spill] sm:$0xff] %v2138_v1  ;;  %v2142_v3 = vpop.permute.xlu0 %480  ;;  %v892_v1 = vsub.f32 1.0, %v1933_v7 }
  0xad   : > { %782 = vperm.xlu2 %1712, %v424_v6   ;;  %777 = vperm.xlu1 %1711, %v423_v30  }
  0xae   : > { %772 = vperm.xlu0 %1710, %v422_v34   ;;  %v924_v34 = vsub.f32 %v892_v1, %v408_v25  ;;  %v910_v25 = vsub.f32 1.0, %v2022_v42  ;;  %v596_v1 = vmul.f32 %v2180_v43, %v2113_v45  ;;  %v599_v45 = vmul.f32 %v2180_v43, %v2117_v29 }
  0xaf   : > { %v2147_v11 = vpop.permute.xlu2 %550  ;;  %v2149_v12 = vpop.permute.xlu1 %500 }
  0xb0   : > { %v2151_v13 = vpop.permute.xlu0 %495 }
  0xb5   : > { %787 = vperm.xlu2 %1712, %v425_v32   ;;  %1070 = vperm.xlu1 %1711, %v940_v23  }
  0xb6   : > { %1030 = vperm.xlu0 %1710, %v932_v31  }
  0xb7   : > { %v2156_v17 = vpop.permute.xlu2 %565  ;;  %v2158_v44 = vpop.permute.xlu1 %515 }
  0xb8   : > { %v2160_v30 = vpop.permute.xlu0 %510 }
  0xbd   : > { %1035 = vperm.xlu2 %1712, %v933_v27   ;;  %990 = vperm.xlu1 %1711, %v924_v34   ;;  %v628_v27 = vld [vmem:[%s2175_s11] sm:$0xff] }
  0xbe   : > { %950 = vperm.xlu0 %1710, %v1992_v24   ;;  %v902_v24 = vsub.f32 1.0, %v1987_v22  ;;  %v942_v22 = vsub.f32 %v910_v25, %v426_v9 }
  0xbf   : > { %v2164_v7 = vpop.permute.xlu2 %580  ;;  %v2166_v16 = vpop.permute.xlu1 %530 }
  0xc0   : > { %v2168_v6 = vpop.permute.xlu0 %525  ;;  %v934_v32 = vsub.f32 %v902_v24, %v418_v47  ;;  %v427_v47 = vld [vmem:[%s1978_s29 + $0xd8] sm:$0xff]  ;;  %v903_v24 = vsub.f32 1.0, %v1984_v21  ;;  %v904_v21 = vsub.f32 1.0, %v1981_v20  ;;  %v640_v20 = vld [vmem:[%s2175_s11 + $0x60] sm:$0xff] }
  0xc5   : > { %792 = vperm.xlu1 %1711, %v426_v9   ;;  %955 = vperm.xlu2 %1712, %v2014_v37   ;;  %v631_v37 = vld [vmem:[%s2175_s11 + $0x18] sm:$0xff]  ;;  %v911_v9 = vsub.f32 1.0, %v2050_v55  ;;  %v935_v55 = vsub.f32 %v903_v24, %v2134_v62  ;;  %v912_v24 = vsub.f32 1.0, %v2047_v54 }
  0xc6   : > { %1075 = vperm.xlu0 %1710, %v941_v8  }
  0xc7   : > { %v663_v50 = vpop.permute.xlu2 %662  ;;  %v2186_v56 = vpop.permute.xlu1 %545 }
  0xc8   : > { %v820_v23 = vmul.f32 %v663_v50, %v628_v27  ;;  %v2190_v31 = vpop.permute.xlu0 %540 }
  0xca   : > { %v2192_v34 = vadd.f32 %v820_v23, %v596_v1  ;;  %v602_v1 = vmul.f32 %v2180_v43, %v2128_v59 }
  0xcd   : > { %1040 = vperm.xlu1 %1711, %v934_v32   ;;  %1080 = vperm.xlu2 %1712, %v942_v22   ;;  %v943_v22 = vsub.f32 %v911_v9, %v427_v47 }
  0xce   : > { %995 = vperm.xlu0 %1710, %v2040_v51   ;;  %v634_v51 = vld [vmem:[%s2175_s11 + $0x30] sm:$0xff] }
  0xcf   : > { %v678_v42 = vpop.permute.xlu2 %677  ;;  %v2196_v52 = vpop.permute.xlu1 %560 }
  0xd0   : > { %v823_v8 = vmul.f32 %v678_v42, %v631_v37  ;;  %v2200_v27 = vpop.permute.xlu0 %555  ;;  %v637_v37 = vld [vmem:[%s2175_s11 + $0x48] sm:$0xff] }
  0xd2   : > { %v2202_v50 = vadd.f32 %v823_v8, %v599_v45  ;;  %v605_v45 = vmul.f32 %v2180_v43, %v2142_v3 }
  0xd5   : > { %960 = vperm.xlu1 %1711, %v2012_v36   ;;  %1000 = vperm.xlu2 %1712, %v2077_v5   ;;  %v428_v5 = vld [vmem:[%s1978_s29 + $0xe0] sm:$0xff] }
  0xd6   : > { %797 = vperm.xlu0 %1710, %v427_v47   ;;  %v936_v47 = vsub.f32 %v904_v21, %v2131_v61  ;;  %v608_v61 = vmul.f32 %v2180_v43, %v2151_v13  ;;  %v597_v21 = vmul.f32 %v2180_v43, %v2119_v46  ;;  %v913_v13 = vsub.f32 1.0, %v2044_v53  ;;  %v633_v46 = vld [vmem:[%s2175_s11 + $0x28] sm:$0xff] }
  0xd7   : > { %v693_v25 = vpop.permute.xlu2 %692  ;;  %v2210_v29 = vpop.permute.xlu1 %575 }
  0xd8   : > { %v826_v23 = vmul.f32 %v693_v25, %v634_v51  ;;  %v2214_v32 = vpop.permute.xlu0 %570  ;;  %v630_v51 = vld [vmem:[%s2175_s11 + $0x10] sm:$0xff]  ;;  %v629_v25 = vld [vmem:[%s2175_s11 + $0x8] sm:$0xff] }
  0xda   : > { %v2217_v36 = vadd.f32 %v826_v23, %v602_v1  ;;  %v598_v23 = vmul.f32 %v2180_v43, %v2111_v41 }
  0xdd   : > { %1085 = vperm.xlu1 %1711, %v943_v22   ;;  %802 = vperm.xlu2 %1712, %v428_v5  }
  0xde   : > { %1045 = vperm.xlu0 %1710, %v935_v55  }
  0xdf   : > { %v708_v42 = vpop.permute.xlu2 %707  ;;  %v2222_v59 = vpop.permute.xlu1 %590 }
  0xe0   : > { %v829_v8 = vmul.f32 %v708_v42, %v637_v37  ;;  %v2226_v62 = vpop.permute.xlu0 %585 }
  0xe2   : > { %v2229_v9 = vadd.f32 %v829_v8, %v605_v45  ;;  %v429_v45 = vld [vmem:[%s1978_s29 + $0xe8] sm:$0xff]  ;;  %v1187_v8 = vld [vmem:[#allocation2 + $0x78] sm:$0xff] }
  0xe3   : > { %1608 = vmatpush.msra.mxu2 %v1187_v8  ;;  %1609 = vmatpush.msra.mxu3 %v1187_v8 }
  0xe4   : > { %1188 = vmatpush.msra.mxu0 %v1187_v8  ;;  %1607 = vmatpush.msra.mxu1 %v1187_v8 }
  0xe5   : > { %1005 = vperm.xlu1 %1711, %v2075_v4   ;;  %1050 = vperm.xlu2 %1712, %v936_v47   ;;  %v643_v47 = vld [vmem:[%s2175_s11 + $0x78] sm:$0xff] }
  0xe6   : > { %965 = vperm.xlu0 %1710, %v2007_v33   ;;  %v944_v33 = vsub.f32 %v912_v24, %v428_v5  ;;  %v1186_v5 = vld [vmem:[#allocation2 + $0x70] sm:$0xff] }
  0xe7   : > { %v723_v1 = vpop.permute.xlu2 %722  ;;  %v673_v3 = vpop.permute.xlu1 %672  ;;  %1611 = vmatpush.msra.mxu2 %v1186_v5  ;;  %1612 = vmatpush.msra.mxu3 %v1186_v5 }
  0xe8   : > { %v832_v22 = vmul.f32 %v723_v1, %v640_v20  ;;  %v822_v4 = vmul.f32 %v673_v3, %v630_v51  ;;  %v668_v55 = vpop.permute.xlu0 %667  ;;  %v632_v20 = vld [vmem:[%s2175_s11 + $0x20] sm:$0xff]  ;;  %v601_v51 = vmul.f32 %v2180_v43, %v2093_v14  ;;  %v611_v1 = vmul.f32 %v2180_v43, %v2160_v30  ;;  %1189 = vmatpush.msra.mxu0 %v1186_v5 }
  0xe9   : > { %v821_v54 = vmul.f32 %v668_v55, %v629_v25  ;;  %v1184_v30 = vld [vmem:[#allocation2 + $0x60] sm:$0xff]  ;;  %1610 = vmatpush.msra.mxu1 %v1186_v5 }
  0xea   : > { %v2243_v37 = vadd.f32 %v832_v22, %v608_v61  ;;  %v2245_v42 = vadd.f32 %v822_v4, %v598_v23  ;;  %v945_v61 = vsub.f32 %v913_v13, %v429_v45  ;;  %v1185_v4 = vld [vmem:[#allocation2 + $0x68] sm:$0xff]  ;;  %v1180_v5 = vld [vmem:[#allocation2 + $0x40] sm:$0xff] }
  0xeb   : > { %v2248_v41 = vadd.f32 %v821_v54, %v597_v21  ;;  %1614 = vmatpush.msra.mxu2 %v1185_v4  ;;  %1615 = vmatpush.msra.mxu3 %v1185_v4  ;;  %v1183_v54 = vld [vmem:[#allocation2 + $0x58] sm:$0xff] }
  0xec   : > { %1190 = vmatpush.msra.mxu0 %v1185_v4  ;;  %1613 = vmatpush.msra.mxu1 %v1185_v4 }
  0xed   : > { %807 = vperm.xlu1 %1711, %v429_v45   ;;  %970 = vperm.xlu2 %1712, %v2037_v49   ;;  %v600_v49 = vmul.f32 %v2180_v43, %v2090_v19  ;;  %v635_v19 = vld [vmem:[%s2175_s11 + $0x38] sm:$0xff] }
  0xee   : > { %1090 = vperm.xlu0 %1710, %v944_v33   ;;  %1617 = vmatpush.msra.mxu2 %v1184_v30  ;;  %v1182_v33 = vld [vmem:[#allocation2 + $0x50] sm:$0xff] }
  0xef   : > { %v738_v24 = vpop.permute.xlu2 %737  ;;  %v688_v25 = vpop.permute.xlu1 %687  ;;  %1618 = vmatpush.msra.mxu3 %v1184_v30  ;;  %1191 = vmatpush.msra.mxu0 %v1184_v30 }
  0xf0   : > { %v835_v53 = vmul.f32 %v738_v24, %v643_v47  ;;  %v825_v3 = vmul.f32 %v688_v25, %v633_v46  ;;  %v683_v23 = vpop.permute.xlu0 %682  ;;  %1620 = vmatpush.msra.mxu2 %v1183_v54  ;;  %v603_v47 = vmul.f32 %v2180_v43, %v2126_v57  ;;  %1616 = vmatpush.msra.mxu1 %v1184_v30  ;;  %v914_v57 = vsub.f32 1.0, %v2068_v0  ;;  %v649_v24 = vld [vmem:[%s2175_s11 + $0xa8] sm:$0xff]  ;;  %v639_v25 = vld [vmem:[%s2175_s11 + $0x58] sm:$0xff] }
  0xf1   : > { %v824_v22 = vmul.f32 %v683_v23, %v632_v20  ;;  %1621 = vmatpush.msra.mxu3 %v1183_v54  ;;  %1192 = vmatpush.msra.mxu0 %v1183_v54  ;;  %v430_v20 = vld [vmem:[%s1978_s29 + $0xf0] sm:$0xff]  ;;  %v617_v0 = vmul.f32 %v2180_v43, %v2190_v31  ;;  %v431_v31 = vld [vmem:[%s1978_s29 + $0xf8] sm:$0xff]  ;;  %s1377_s29 = scalar_lea.hbm %s2501_s6, %s1511_s20 }
  0xf2   : > { %v2261_v14 = vadd.f32 %v835_v53, %v611_v1  ;;  %v2263_v55 = vadd.f32 %v825_v3, %v601_v51  ;;  %1623 = vmatpush.msra.mxu2 %v1182_v33  ;;  %1619 = vmatpush.msra.mxu1 %v1183_v54  ;;  %v1179_v51 = vld [vmem:[#allocation2 + $0x38] sm:$0xff]  ;;  %v638_v1 = vld [vmem:[%s2175_s11 + $0x50] sm:$0xff]  ;;  %v607_v3 = vmul.f32 %v2180_v43, %v2109_v40  ;;  %v1177_v40 = vld [vmem:[#allocation2 + $0x28] sm:$0xff]  ;;  %s1380_s10 = sshll.u32 %s1377_s29, 4  ;;  %s1381_s10 = int_to_ptr.hbm [resolvable:$true] %s1380_s10 }
  0xf3   : > { %v2265_v21 = vadd.f32 %v824_v22, %v600_v49  ;;  %1624 = vmatpush.msra.mxu3 %v1182_v33  ;;  %1193 = vmatpush.msra.mxu0 %v1182_v33  ;;  %v1178_v53 = vld [vmem:[#allocation2 + $0x30] sm:$0xff]  ;;  %v606_v22 = vmul.f32 %v2180_v43, %v2140_v2  ;;  %v946_v4 = vsub.f32 %v914_v57, %v430_v20 }
  0xf4   : > { %1622 = vmatpush.msra.mxu1 %v1182_v33  ;;  %v642_v2 = vld [vmem:[%s2175_s11 + $0x70] sm:$0xff] }
  0xf5   : > { %1055 = vperm.xlu1 %1711, %v2097_v26   ;;  %1095 = vperm.xlu2 %1712, %v945_v61   ;;  %v1174_v57 = vld [vmem:[#allocation2 + $0x10] sm:$0xff] }
  0xf6   : > { %1010 = vperm.xlu0 %1710, %v2060_v60   ;;  %v1181_v60 = vld [vmem:[#allocation2 + $0x48] sm:$0xff] }
  0xf7   : > { %v2270_v45 = vpop.permute.xlu2 %752  ;;  %v2272_v8 = vpop.permute.xlu1 %702  ;;  %1626 = vmatpush.msra.mxu2 %v1181_v60  ;;  %1627 = vmatpush.msra.mxu3 %v1181_v60 }
  0xf8   : > { %v698_v13 = vpop.permute.xlu0 %697  ;;  %1194 = vmatpush.msra.mxu0 %v1181_v60  ;;  %1625 = vmatpush.msra.mxu1 %v1181_v60 }
  0xf9   : > { %v827_v26 = vmul.f32 %v698_v13, %v635_v19  ;;  %1629 = vmatpush.msra.mxu2 %v1180_v5  ;;  %1630 = vmatpush.msra.mxu3 %v1180_v5  ;;  %v1176_v13 = vld [vmem:[#allocation2 + $0x20] sm:$0xff] }
  0xfa   : > { %1195 = vmatpush.msra.mxu0 %v1180_v5  ;;  %1628 = vmatpush.msra.mxu1 %v1180_v5  ;;  %v610_v5 = vmul.f32 %v2180_v43, %v2115_v28  ;;  %v1172_v28 = vld [vmem:[#allocation2] sm:$0xff] }
  0xfb   : > { %v2276_v46 = vadd.f32 %v827_v26, %v603_v47  ;;  %1632 = vmatpush.msra.mxu2 %v1179_v51  ;;  %1633 = vmatpush.msra.mxu3 %v1179_v51  ;;  %v1175_v47 = vld [vmem:[#allocation2 + $0x18] sm:$0xff]  ;;  %v641_v26 = vld [vmem:[%s2175_s11 + $0x68] sm:$0xff] }
  0xfc   : > { %1196 = vmatpush.msra.mxu0 %v1179_v51  ;;  %1631 = vmatpush.msra.mxu1 %v1179_v51 }
  0xfd   : > { %975 = vperm.xlu1 %1711, %v2035_v48   ;;  %1015 = vperm.xlu2 %1712, %v2088_v18  }
  0xfe   : > { %812 = vperm.xlu0 %1710, %v430_v20   ;;  %1635 = vmatpush.msra.mxu2 %v1178_v53 }
  0xff   : > { %v768_v23 = vpop.permute.xlu2 %767  ;;  %v718_v49 = vpop.permute.xlu1 %717  ;;  %1636 = vmatpush.msra.mxu3 %v1178_v53  ;;  %1197 = vmatpush.msra.mxu0 %v1178_v53 }
 0x100   : > { %v841_v48 = vmul.f32 %v768_v23, %v649_v24  ;;  %v831_v61 = vmul.f32 %v718_v49, %v639_v25  ;;  %v713_v18 = vpop.permute.xlu0 %712  ;;  %1638 = vmatpush.msra.mxu2 %v1177_v40  ;;  %1634 = vmatpush.msra.mxu1 %v1178_v53 }
 0x101   : > { %v830_v30 = vmul.f32 %v713_v18, %v638_v1  ;;  %1639 = vmatpush.msra.mxu3 %v1177_v40  ;;  %v609_v1 = vmul.f32 %v2180_v43, %v2149_v12  ;;  %1198 = vmatpush.msra.mxu0 %v1177_v40  ;;  %v915_v12 = vsub.f32 1.0, %v2065_v63 }
 0x102   : > { %v2291_v54 = vadd.f32 %v841_v48, %v617_v0  ;;  %v2293_v19 = vadd.f32 %v831_v61, %v607_v3  ;;  %1641 = vmatpush.msra.mxu2 %v1176_v13  ;;  %1637 = vmatpush.msra.mxu1 %v1177_v40  ;;  %v650_v61 = vld [vmem:[%s2175_s11 + $0xb0] sm:$0xff]  ;;  %v652_v40 = vld [vmem:[%s2175_s11 + $0xc0] sm:$0xff] }
 0x103   : > { %v2296_v33 = vadd.f32 %v830_v30, %v606_v22  ;;  %1642 = vmatpush.msra.mxu3 %v1176_v13  ;;  %1199 = vmatpush.msra.mxu0 %v1176_v13  ;;  %v947_v48 = vsub.f32 %v915_v12, %v431_v31  ;;  %v618_v30 = vmul.f32 %v2180_v43, %v2186_v56  ;;  %v360_v56 = vld [vmem:[%s2340_s16 + $0xc0] sm:$0xff] }
 0x104   : > { %1644 = vmatpush.msra.mxu2 %v1175_v47  ;;  %1640 = vmatpush.msra.mxu1 %v1176_v13  ;;  %v644_v13 = vld [vmem:[%s2175_s11 + $0x80] sm:$0xff] }
 0x105   : > { %1100 = vperm.xlu1 %1711, %v946_v4   ;;  %817 = vperm.xlu2 %1712, %v431_v31  }
 0x106   : > { %1060 = vperm.xlu0 %1710, %v2107_v38   ;;  %1645 = vmatpush.msra.mxu3 %v1175_v47  ;;  %v1173_v38 = vld [vmem:[#allocation2 + $0x8] sm:$0xff] }
 0x107   : > { %v2301_v60 = vpop.permute.xlu2 %782  ;;  %v733_v20 = vpop.permute.xlu1 %732  ;;  %1647 = vmatpush.msra.mxu2 %v1174_v57  ;;  %1200 = vmatpush.msra.mxu0 %v1175_v47 }
 0x108   : > { %v834_v24 = vmul.f32 %v733_v20, %v642_v2  ;;  %v728_v25 = vpop.permute.xlu0 %727  ;;  %1648 = vmatpush.msra.mxu3 %v1174_v57  ;;  %1643 = vmatpush.msra.mxu1 %v1175_v47  ;;  %v620_v20 = vmul.f32 %v2180_v43, %v2200_v27  ;;  %v353_v27 = vld [vmem:[%s2340_s16 + $0x88] sm:$0xff] }
 0x109   : > { %v833_v3 = vmul.f32 %v728_v25, %v641_v26  ;;  %1650 = vmatpush.msra.mxu2 %v1173_v38  ;;  %1201 = vmatpush.msra.mxu0 %v1174_v57  ;;  %v844_v26 = vmul.f32 %v2301_v60, %v652_v40 }
 0x10a   : > { %v2307_v23 = vadd.f32 %v834_v24, %v610_v5  ;;  %1651 = vmatpush.msra.mxu3 %v1173_v38  ;;  %1646 = vmatpush.msra.mxu1 %v1174_v57  ;;  %v352_v57 = vld [vmem:[%s2340_s16 + $0x80] sm:$0xff]  ;;  %v612_v5 = vmul.f32 %v2180_v43, %v2158_v44 }
 0x10b   : > { %v2309_v51 = vadd.f32 %v833_v3, %v609_v1  ;;  %1653 = vmatpush.msra.mxu2 %v1172_v28  ;;  %1202 = vmatpush.msra.mxu0 %v1173_v38  ;;  %v876_v60 = vadd.f32 %v844_v26, %v620_v20  ;;  %v636_v3 = vld [vmem:[%s2175_s11 + $0x40] sm:$0xff] }
 0x10c   : > { %1654 = vmatpush.msra.mxu3 %v1172_v28  ;;  %1649 = vmatpush.msra.mxu1 %v1173_v38  ;;  %v344_v44 = vld [vmem:[%s2340_s16 + $0x40] sm:$0xff] }
 0x10d   : > { %1020 = vperm.xlu1 %1711, %v2086_v15   ;;  %1065 = vperm.xlu2 %1712, %v2105_v35   ;;  %v651_v35 = vld [vmem:[%s2175_s11 + $0xb8] sm:$0xff] }
 0x10e   : > { %980 = vperm.xlu0 %1710, %v2017_v39   ;;  %1203 = vmatpush.msra.mxu0 %v1172_v28 }
 0x10f   : > { %v2315_v53 = vpop.permute.xlu2 %787  ;;  %v748_v49 = vpop.permute.xlu1 %747  ;;  %1652 = vmatpush.msra.mxu1 %v1172_v28 }
 0x110   : > { %v743_v0 = vpop.permute.xlu0 %742 }
 0x115   : > { %985 = vperm.xlu1 %1711, %v2057_v58   ;;  %1025 = vperm.xlu2 %1712, %v2082_v10   ;;  %v619_v58 = vmul.f32 %v2180_v43, %v2147_v11  ;;  %v836_v11 = vmul.f32 %v743_v0, %v644_v13  ;;  %v645_v0 = vld [vmem:[%s2175_s11 + $0x88] sm:$0xff] }
 0x116   : > { %1105 = vperm.xlu0 %1710, %v947_v48  }
 0x117   : > { %v1036_v39 = vpop.permute.xlu2 %1035  ;;  %v2319_v63 = vpop.permute.xlu1 %762  ;;  %v868_v38 = vadd.f32 %v836_v11, %v612_v5 }
 0x118   : > { %v2321_v15 = vpop.permute.xlu0 %757 }
 0x11f   : > { %v778_v18 = vpop.permute.xlu1 %777  ;;  %v956_v22 = vpop.permute.xlu2 %955 }
 0x120   : > { %v843_v10 = vmul.f32 %v778_v18, %v651_v35  ;;  %v773_v4 = vpop.permute.xlu0 %772  ;;  %v837_v18 = vmul.f32 %v748_v49, %v645_v0  ;;  %v653_v49 = vld [vmem:[%s2175_s11 + $0xc8] sm:$0xff]  ;;  %v654_v0 = vld [vmem:[%s2175_s11 + $0xd0] sm:$0xff] }
 0x121   : > { %v842_v31 = vmul.f32 %v773_v4, %v650_v61  ;;  %v828_v61 = vmul.f32 %v2272_v8, %v636_v3  ;;  %v336_v4 = vld [vmem:[%s2340_s16] sm:$0xff]  ;;  %v621_v3 = vmul.f32 %v2180_v43, %v2196_v52 }
 0x122   : > { %v2331_v2 = vadd.f32 %v843_v10, %v619_v58  ;;  %v2507_v58 = vld [vmem:[#allocation8_spill] sm:$0xff] }
 0x123   : > { %v2333_v47 = vadd.f32 %v842_v31, %v618_v30  ;;  %v604_v10 = vmul.f32 %v2180_v43, %v2507_v58  ;;  %v2508_v30 = vld [vmem:[#allocation9_spill] sm:$0xff]  ;;  %v1125_v31 = vmul.f32 %v1036_v39, %v353_v27  ;;  %v622_v58 = vmul.f32 %v2180_v43, %v2156_v17 }
 0x124   : > { %v613_v40 = vmul.f32 %v2180_v43, %v2508_v30  ;;  %v361_v39 = vld [vmem:[%s2340_s16 + $0xc8] sm:$0xff] }
 0x125   : > { %v860_v26 = vadd.f32 %v828_v61, %v604_v10  ;;  %v614_v10 = vmul.f32 %v2180_v43, %v2168_v6  ;;  %v345_v30 = vld [vmem:[%s2340_s16 + $0x48] sm:$0xff]  ;;  %v338_v6 = vld [vmem:[%s2340_s16 + $0x10] sm:$0xff] }
 0x127   : > { %v1071_v24 = vpop.permute.xlu1 %1070  ;;  %v1081_v28 = vpop.permute.xlu2 %1080 }
 0x128   : > { %v1132_v25 = vmul.f32 %v1071_v24, %v360_v56  ;;  %v1031_v1 = vpop.permute.xlu0 %1030  ;;  %v869_v56 = vadd.f32 %v837_v18, %v613_v40 }
 0x129   : > { %v1124_v12 = vmul.f32 %v1031_v1, %v352_v57  ;;  %v845_v1 = vmul.f32 %v2315_v53, %v653_v49 }
 0x12a   : > { %v1164_v48 = vadd.f32 %v1132_v25, %v876_v60  ;;  %v1157_v60 = vadd.f32 %v1125_v31, %v869_v56  ;;  %v337_v25 = vld [vmem:[%s2340_s16 + $0x8] sm:$0xff] }
 0x12b   : > { %v1156_v35 = vadd.f32 %v1124_v12, %v868_v38  ;;  %v1109_v38 = vmul.f32 %v956_v22, %v337_v25  ;;  %v354_v22 = vld [vmem:[%s2340_s16 + $0x90] sm:$0xff] }
 0x12c   : > { %1276 = vmatmul.f32.vlgmr.msra.gmra.mxu3 %v1164_v48 }
 0x12d   : > { %1252 = vmatmul.f32.vlgmr.msra.gmra.mxu2 %v1156_v35  ;;  %v646_v35 = vld [vmem:[%s2175_s11 + $0x90] sm:$0xff]  ;;  %v1141_v18 = vadd.f32 %v1109_v38, %v2248_v41 }
 0x12f   : > { %v991_v13 = vpop.permute.xlu1 %990  ;;  %v1001_v5 = vpop.permute.xlu2 %1000 }
 0x130   : > { %v1116_v11 = vmul.f32 %v991_v13, %v344_v44  ;;  %v951_v8 = vpop.permute.xlu0 %950  ;;  %v838_v44 = vmul.f32 %v2270_v45, %v646_v35 }
 0x131   : > { %v1108_v20 = vmul.f32 %v951_v8, %v336_v4  ;;  %v362_v4 = vld [vmem:[%s2340_s16 + $0xd0] sm:$0xff] }
 0x132   : > { %v1148_v57 = vadd.f32 %v1116_v11, %v860_v26  ;;  %v870_v31 = vadd.f32 %v838_v44, %v614_v10  ;;  %v1134_v26 = vmul.f32 %v1081_v28, %v362_v4  ;;  %v647_v28 = vld [vmem:[%s2175_s11 + $0x98] sm:$0xff]  ;;  %v2509_v10 = vld [vmem:[#allocation10_spill] sm:$0xff] }
 0x133   : > { %v1140_v24 = vadd.f32 %v1108_v20, %v2192_v34  ;;  %v877_v34 = vadd.f32 %v845_v1, %v621_v3  ;;  %v346_v20 = vld [vmem:[%s2340_s16 + $0x50] sm:$0xff]  ;;  %v655_v1 = vld [vmem:[%s2175_s11 + $0xd8] sm:$0xff]  ;;  %v839_v38 = vmul.f32 %v2321_v15, %v647_v28  ;;  %v648_v15 = vld [vmem:[%s2175_s11 + $0xa0] sm:$0xff]  ;;  %v616_v4 = vmul.f32 %v2180_v43, %v2509_v10 }
 0x134   : > { %1228 = vmatmul.f32.vlgmr.msra.gmra.mxu1 %v1148_v57  ;;  %v1118_v49 = vmul.f32 %v1001_v5, %v346_v20  ;;  %v623_v5 = vmul.f32 %v2180_v43, %v2214_v32  ;;  %v840_v32 = vmul.f32 %v2319_v63, %v648_v15  ;;  %v358_v10 = vld [vmem:[%s2340_s16 + $0xb0] sm:$0xff] }
 0x135   : > { %1204 = vmatmul.f32.vlgmr.msra.gmra.mxu0 %v1140_v24  ;;  %1255 = vmatmul.f32.gmra.mxu2 %v1157_v60 }
 0x136   : > { %v1150_v3 = vadd.f32 %v1118_v49, %v2296_v33  ;;  %v624_v49 = vmul.f32 %v2180_v43, %v2210_v29  ;;  %v365_v29 = vld [vmem:[%s2340_s16 + $0xe8] sm:$0xff] }
 0x137   : > { %v793_v12 = vpop.permute.xlu1 %792  ;;  %v2371_v52 = vpop.permute.xlu2 %802 }
 0x138   : > { %v1076_v48 = vpop.permute.xlu0 %1075  ;;  %v846_v27 = vmul.f32 %v793_v12, %v654_v0  ;;  %v363_v12 = vld [vmem:[%s2340_s16 + $0xd8] sm:$0xff] }
 0x139   : > { %v1133_v61 = vmul.f32 %v1076_v48, %v361_v39  ;;  %v355_v0 = vld [vmem:[%s2340_s16 + $0x98] sm:$0xff]  ;;  %v615_v48 = vmul.f32 %v2180_v43, %v2166_v16 }
 0x13a   : > { %v878_v40 = vadd.f32 %v846_v27, %v622_v58  ;;  %v356_v58 = vld [vmem:[%s2340_s16 + $0xa0] sm:$0xff]  ;;  %v339_v16 = vld [vmem:[%s2340_s16 + $0x18] sm:$0xff] }
 0x13b   : > { %v1165_v53 = vadd.f32 %v1133_v61, %v877_v34  ;;  %v871_v61 = vadd.f32 %v839_v38, %v615_v48  ;;  %v348_v38 = vld [vmem:[%s2340_s16 + $0x60] sm:$0xff] }
 0x13c   : > { %v1166_v56 = vadd.f32 %v1134_v26, %v878_v40  ;;  %v656_v26 = vld [vmem:[%s2175_s11 + $0xe0] sm:$0xff] }
 0x13d   : > { %1207 = vmatmul.f32.gmra.mxu0 %v1141_v18  ;;  %1279 = vmatmul.f32.gmra.mxu3 %v1165_v53  ;;  %v848_v20 = vmul.f32 %v2371_v52, %v656_v26  ;;  %v625_v52 = vmul.f32 %v2180_v43, %v2164_v7  ;;  %v350_v26 = vld [vmem:[%s2340_s16 + $0x70] sm:$0xff] }
 0x13f   : > { %v1041_v41 = vpop.permute.xlu1 %1040  ;;  %v1051_v57 = vpop.permute.xlu2 %1050 }
 0x140   : > { %v1126_v13 = vmul.f32 %v1041_v41, %v354_v22  ;;  %v996_v45 = vpop.permute.xlu0 %995  ;;  %v347_v22 = vld [vmem:[%s2340_s16 + $0x58] sm:$0xff] }
 0x141   : > { %v1117_v17 = vmul.f32 %v996_v45, %v345_v30  ;;  %v1128_v30 = vmul.f32 %v1051_v57, %v356_v58  ;;  %v658_v58 = vld [vmem:[%s2175_s11 + $0xf0] sm:$0xff] }
 0x142   : > { %v1158_v11 = vadd.f32 %v1126_v13, %v870_v31  ;;  %v872_v13 = vadd.f32 %v840_v32, %v616_v4 }
 0x143   : > { %v1149_v8 = vadd.f32 %v1117_v17, %v2229_v9 }
 0x144   : > { %1258 = vmatmul.f32.gmra.mxu2 %v1158_v11 }
 0x145   : > { %1231 = vmatmul.f32.gmra.mxu1 %v1149_v8  ;;  %1282 = vmatmul.f32.gmra.mxu3 %v1166_v56  ;;  %v1160_v8 = vadd.f32 %v1128_v30, %v872_v13  ;;  %v340_v56 = vld [vmem:[%s2340_s16 + $0x20] sm:$0xff] }
 0x147   : > { %v961_v24 = vpop.permute.xlu1 %960  ;;  %v971_v27 = vpop.permute.xlu2 %970 }
 0x148   : > { %v1110_v60 = vmul.f32 %v961_v24, %v338_v6  ;;  %v798_v25 = vpop.permute.xlu0 %797  ;;  %v364_v6 = vld [vmem:[%s2340_s16 + $0xe0] sm:$0xff]  ;;  %v1112_v57 = vmul.f32 %v971_v27, %v340_v56 }
 0x149   : > { %v847_v9 = vmul.f32 %v798_v25, %v655_v1  ;;  %v880_v25 = vadd.f32 %v848_v20, %v624_v49  ;;  %v659_v20 = vld [vmem:[%s2175_s11 + $0xf8] sm:$0xff] }
 0x14a   : > { %v1142_v39 = vadd.f32 %v1110_v60, %v2245_v42  ;;  %v1144_v28 = vadd.f32 %v1112_v57, %v2265_v21  ;;  %v351_v57 = vld [vmem:[%s2340_s16 + $0x78] sm:$0xff] }
 0x14b   : > { %v879_v35 = vadd.f32 %v847_v9, %v623_v5  ;;  %v357_v9 = vld [vmem:[%s2340_s16 + $0xa8] sm:$0xff] }
 0x14c   : > { %1210 = vmatmul.f32.gmra.mxu0 %v1142_v39 }
 0x14d   : > { %1234 = vmatmul.f32.gmra.mxu1 %v1150_v3 }
 0x14f   : > { %v1086_v42 = vpop.permute.xlu1 %1085  ;;  %v1096_v11 = vpop.permute.xlu2 %1095 }
 0x150   : > { %v1135_v33 = vmul.f32 %v1086_v42, %v363_v12  ;;  %v1046_v34 = vpop.permute.xlu0 %1045  ;;  %v1137_v42 = vmul.f32 %v1096_v11, %v365_v29 }
 0x151   : > { %v1127_v18 = vmul.f32 %v1046_v34, %v355_v0  ;;  %v349_v34 = vld [vmem:[%s2340_s16 + $0x68] sm:$0xff] }
 0x152   : > { %v1167_v53 = vadd.f32 %v1135_v33, %v879_v35 }
 0x153   : > { %v1159_v44 = vadd.f32 %v1127_v18, %v871_v61  ;;  %v341_v61 = vld [vmem:[%s2340_s16 + $0x28] sm:$0xff] }
 0x154   : > { %1285 = vmatmul.f32.gmra.mxu3 %v1167_v53 }
 0x155   : > { %1261 = vmatmul.f32.gmra.mxu2 %v1159_v44 }
 0x157   : > { %v1006_v40 = vpop.permute.xlu1 %1005  ;;  %v1016_v3 = vpop.permute.xlu2 %1015 }
 0x158   : > { %v1119_v41 = vmul.f32 %v1006_v40, %v347_v22  ;;  %v966_v31 = vpop.permute.xlu0 %965  ;;  %v1121_v27 = vmul.f32 %v1016_v3, %v349_v34  ;;  %v366_v22 = vld [vmem:[%s2340_s16 + $0xf0] sm:$0xff] }
 0x159   : > { %v1111_v45 = vmul.f32 %v966_v31, %v339_v16  ;;  %v626_v16 = vmul.f32 %v2180_v43, %v2226_v62 }
 0x15a   : > { %v1151_v17 = vadd.f32 %v1119_v41, %v2293_v19  ;;  %v657_v19 = vld [vmem:[%s2175_s11 + $0xe8] sm:$0xff]  ;;  %s1758_s11 = sshra.s32 %s1381_s10, 4  ;;  %s1759_s11 = int_to_ptr.hbm [resolvable:$true] %s1758_s11 }
 0x15b   : > { %v1143_v63 = vadd.f32 %v1111_v45, %v2202_v50  ;;  %v359_v45 = vld [vmem:[%s2340_s16 + $0xb8] sm:$0xff]  ;;  %s1760_s12 = scalar_lea.hbm %s1759_s11, 128  ;;  %p1765_p3 = scmp.lt.s32.totalorder %s1759_s11, %s2501_s6 }
 0x15c   : > { %1237 = vmatmul.f32.gmra.mxu1 %v1151_v17  ;;  %v342_v17 = vld [vmem:[%s2340_s16 + $0x30] sm:$0xff]  ;;  %p1761_p0 = scmp.ne.s32.totalorder %s1759_s11, %s1760_s12  ;;  %p1766_p4 = scmp.lt.s32.totalorder %s1764_s15, %s1760_s12 }
 0x15d   : > { %1213 = vmatmul.f32.gmra.mxu0 %v1143_v63  ;;  %1264 = vmatmul.f32.gmra.mxu2 %v1160_v8 }
 0x15e   : > { %p1762_p1 = pnand %p1761_p0, %p1891_p5  ;;  %p1767_p7 = por %p1766_p4, %p1765_p3 }
 0x15f   : > { %v808_v24 = vpop.permute.xlu1 %807  ;;  %v818_v18 = vpop.permute.xlu2 %817 }
 0x160   : > { %v1091_v60 = vpop.permute.xlu0 %1090  ;;  %v849_v1 = vmul.f32 %v808_v24, %v657_v19  ;;  %v851_v19 = vmul.f32 %v818_v18, %v659_v20  ;;  %p1763_p2 = pneg %p1762_p1 }
 0x161   : > { %v1136_v50 = vmul.f32 %v1091_v60, %v364_v6  ;;  %v343_v60 = vld [vmem:[%s2340_s16 + $0x38] sm:$0xff] }
 0x162   : > { %v881_v12 = vadd.f32 %v849_v1, %v625_v52  ;;  %v627_v1 = vmul.f32 %v2180_v43, %v2222_v59  ;;  %p1768_p8 = pnand %p1767_p7, %p1763_p2 }
 0x163   : > { %v1168_v39 = vadd.f32 %v1136_v50, %v880_v25  ;;  %v367_v50 = vld [vmem:[%s2340_s16 + $0xf8] sm:$0xff] }
 0x164   : > { %v1169_v7 = vadd.f32 %v1137_v42, %v881_v12  ;;  %v883_v52 = vadd.f32 %v851_v19, %v627_v1 }
 0x165   : > { %1216 = vmatmul.f32.gmra.mxu0 %v1144_v28  ;;  %1288 = vmatmul.f32.gmra.mxu3 %v1168_v39 }
 0x167   : > { %v1056_v5 = vpop.permute.xlu1 %1055  ;;  %v1066_v31 = vpop.permute.xlu2 %1065 }
 0x168   : > { %v1129_v0 = vmul.f32 %v1056_v5, %v357_v9  ;;  %v1011_v48 = vpop.permute.xlu0 %1010  ;;  %v1131_v11 = vmul.f32 %v1066_v31, %v359_v45 }
 0x169   : > { %v1120_v35 = vmul.f32 %v1011_v48, %v348_v38 }
 0x16a   : > { %v1161_v21 = vadd.f32 %v1129_v0, %v2291_v54  ;;  %v1153_v54 = vadd.f32 %v1121_v27, %v2309_v51 }
 0x16b   : > { %v1152_v33 = vadd.f32 %v1120_v35, %v2243_v37 }
 0x16c   : > { %1267 = vmatmul.f32.gmra.mxu2 %v1161_v21 }
 0x16d   : > { %1240 = vmatmul.f32.gmra.mxu1 %v1152_v33  ;;  %1291 = vmatmul.f32.gmra.mxu3 %v1169_v7 }
 0x16f   : > { %v976_v15 = vpop.permute.xlu1 %975  ;;  %v1026_v49 = vpop.permute.xlu2 %1025 }
 0x170   : > { %v1113_v53 = vmul.f32 %v976_v15, %v341_v61  ;;  %v813_v44 = vpop.permute.xlu0 %812  ;;  %v1123_v25 = vmul.f32 %v1026_v49, %v351_v57 }
 0x171   : > { %v850_v37 = vmul.f32 %v813_v44, %v658_v58 }
 0x172   : > { %v1145_v32 = vadd.f32 %v1113_v53, %v2263_v55 }
 0x173   : > { %v882_v30 = vadd.f32 %v850_v37, %v626_v16 }
 0x174   : > { %1219 = vmatmul.f32.gmra.mxu0 %v1145_v32 }
 0x175   : > { %1243 = vmatmul.f32.gmra.mxu1 %v1153_v54 }
 0x177   : > { %v1101_v4 = vpop.permute.xlu1 %1100 }
 0x178   : > { %v1138_v40 = vmul.f32 %v1101_v4, %v366_v22  ;;  %v1061_v41 = vpop.permute.xlu0 %1060 }
 0x179   : > { %v1130_v55 = vmul.f32 %v1061_v41, %v358_v10 }
 0x17a   : > { %v1170_v13 = vadd.f32 %v1138_v40, %v882_v30 }
 0x17b   : > { %v1162_v51 = vadd.f32 %v1130_v55, %v2333_v47  ;;  %v1163_v47 = vadd.f32 %v1131_v11, %v2331_v2  ;;  %v1155_v2 = vadd.f32 %v1123_v25, %v2261_v14 }
 0x17c   : > { %1294 = vmatmul.f32.gmra.mxu3 %v1170_v13 }
 0x17d   : > { %1270 = vmatmul.f32.gmra.mxu2 %v1162_v51 }
 0x17f   : > { %v1021_v62 = vpop.permute.xlu1 %1020 }
 0x180   : > { %v1122_v63 = vmul.f32 %v1021_v62, %v350_v26  ;;  %v981_v8 = vpop.permute.xlu0 %980 }
 0x181   : > { %v1114_v56 = vmul.f32 %v981_v8, %v342_v17 }
 0x182   : > { %v1154_v6 = vadd.f32 %v1122_v63, %v2307_v23 }
 0x183   : > { %v1146_v24 = vadd.f32 %v1114_v56, %v2217_v36 }
 0x184   : > { %1246 = vmatmul.f32.gmra.mxu1 %v1154_v6 }
 0x185   : > { %1222 = vmatmul.f32.gmra.mxu0 %v1146_v24  ;;  %1273 = vmatmul.f32.gmra.mxu2 %v1163_v47 }
 0x187   : > { %v986_v28 = vpop.permute.xlu1 %985 }
 0x188   : > { %v1115_v23 = vmul.f32 %v986_v28, %v343_v60  ;;  %v1106_v39 = vpop.permute.xlu0 %1105 }
 0x189   : > { %v1139_v3 = vmul.f32 %v1106_v39, %v367_v50 }
 0x18a   : > { %v1147_v36 = vadd.f32 %v1115_v23, %v2276_v46 }
 0x18b   : > { %v1171_v9 = vadd.f32 %v1139_v3, %v883_v52 }
 0x18c   : > { %1249 = vmatmul.f32.gmra.mxu1 %v1155_v2 }
 0x18d   : > { %1225 = vmatmul.f32.gmra.mxu0 %v1147_v36  ;;  %1297 = vmatmul.f32.gmra.mxu3 %v1171_v9 }
 0x1af   : > { %v1277_v12 = vpop.f32.mrf.mxu3 }
 0x1b0   : > { %v1253_v29 = vpop.f32.mrf.mxu2 }
 0x1b1   : > { %v1229_v5 = vpop.f32.mrf.mxu1 }
 0x1b2   : > { %v1205_v38 = vpop.f32.mrf.mxu0 }
 0x1b8   : > { %v1256_v43 = vpop.f32.mrf.mxu2 }
 0x1b9   : > { %v1555_v59 = vpack.c.bf16 %v1256_v43, %v1253_v29 }
 0x1ba   : > { %v1208_v0 = vpop.f32.mrf.mxu0 }
 0x1bb   : > { %1599 = vst [vmem:[%s2443_s19 + $0x40] sm:$0xff] %v1555_v59   ;;  %v1515_v14 = vpack.c.bf16 %v1208_v0, %v1205_v38 }
 0x1bd   : > { %1516 = vst [vmem:[%s2443_s19] sm:$0xff] %v1515_v14  }
 0x1c0   : > { %v1280_v46 = vpop.f32.mrf.mxu3 }
 0x1c1   : > { %v1575_v48 = vpack.c.bf16 %v1280_v46, %v1277_v12 }
 0x1c2   : > { %v1232_v42 = vpop.f32.mrf.mxu1 }
 0x1c3   : > { %1603 = vst [vmem:[%s2443_s19 + $0x60] sm:$0xff] %v1575_v48   ;;  %v1535_v35 = vpack.c.bf16 %v1232_v42, %v1229_v5 }
 0x1c5   : > { %1595 = vst [vmem:[%s2443_s19 + $0x20] sm:$0xff] %v1535_v35  }
 0x1c7   : > { %v1259_v33 = vpop.f32.mrf.mxu2 }
 0x1c8   : > { %v1283_v21 = vpop.f32.mrf.mxu3 }
 0x1c9   : > { %v1211_v34 = vpop.f32.mrf.mxu0 }
 0x1ca   : > { %v1235_v7 = vpop.f32.mrf.mxu1 }
 0x1d7   : > { %v1286_v61 = vpop.f32.mrf.mxu3 }
 0x1d8   : > { %v1262_v27 = vpop.f32.mrf.mxu2  ;;  %v1580_v18 = vpack.c.bf16 %v1286_v61, %v1283_v21 }
 0x1d9   : > { %v1560_v15 = vpack.c.bf16 %v1262_v27, %v1259_v33  ;;  %v1238_v53 = vpop.f32.mrf.mxu1 }
 0x1da   : > { %1604 = vst [vmem:[%s2443_s19 + $0x68] sm:$0xff] %v1580_v18   ;;  %v1214_v44 = vpop.f32.mrf.mxu0  ;;  %v1540_v58 = vpack.c.bf16 %v1238_v53, %v1235_v7 }
 0x1db   : > { %1600 = vst [vmem:[%s2443_s19 + $0x48] sm:$0xff] %v1560_v15   ;;  %v1520_v32 = vpack.c.bf16 %v1214_v44, %v1211_v34 }
 0x1dc   : > { %1596 = vst [vmem:[%s2443_s19 + $0x28] sm:$0xff] %v1540_v58  }
 0x1dd   : > { %1592 = vst [vmem:[%s2443_s19 + $0x8] sm:$0xff] %v1520_v32  }
 0x1e0   : > { %v1265_v54 = vpop.f32.mrf.mxu2 }
 0x1e2   : > { %v1217_v22 = vpop.f32.mrf.mxu0 }
 0x1e8   : > { %v1289_v37 = vpop.f32.mrf.mxu3 }
 0x1ea   : > { %v1241_v16 = vpop.f32.mrf.mxu1 }
 0x1ef   : > { %v1268_v10 = vpop.f32.mrf.mxu2 }
 0x1f0   : > { %v1565_v4 = vpack.c.bf16 %v1268_v10, %v1265_v54  ;;  %v1292_v30 = vpop.f32.mrf.mxu3 }
 0x1f1   : > { %v1585_v40 = vpack.c.bf16 %v1292_v30, %v1289_v37  ;;  %v1220_v41 = vpop.f32.mrf.mxu0 }
 0x1f2   : > { %1601 = vst [vmem:[%s2443_s19 + $0x50] sm:$0xff] %v1565_v4   ;;  %v1525_v31 = vpack.c.bf16 %v1220_v41, %v1217_v22  ;;  %v1244_v55 = vpop.f32.mrf.mxu1 }
 0x1f3   : > { %1605 = vst [vmem:[%s2443_s19 + $0x70] sm:$0xff] %v1585_v40   ;;  %v1545_v13 = vpack.c.bf16 %v1244_v55, %v1241_v16 }
 0x1f4   : > { %1593 = vst [vmem:[%s2443_s19 + $0x10] sm:$0xff] %v1525_v31  }
 0x1f5   : > { %1597 = vst [vmem:[%s2443_s19 + $0x30] sm:$0xff] %v1545_v13  }
 0x1ff   : > { %v1295_v17 = vpop.f32.mrf.mxu3 }
 0x200   : > { %v1271_v51 = vpop.f32.mrf.mxu2 }
 0x201   : > { %v1247_v45 = vpop.f32.mrf.mxu1 }
 0x202   : > { %v1223_v26 = vpop.f32.mrf.mxu0 }
 0x208   : > { %v1274_v11 = vpop.f32.mrf.mxu2 }
 0x209   : > { %v1570_v62 = vpack.c.bf16 %v1274_v11, %v1271_v51  ;;  %v1250_v63 = vpop.f32.mrf.mxu1 }
 0x20a   : > { %v1226_v8 = vpop.f32.mrf.mxu0  ;;  %v1550_v56 = vpack.c.bf16 %v1250_v63, %v1247_v45 }
 0x20b   : > { %1602 = vst [vmem:[%s2443_s19 + $0x58] sm:$0xff] %v1570_v62   ;;  %v1530_v20 = vpack.c.bf16 %v1226_v8, %v1223_v26 }
 0x20c   : > { %1598 = vst [vmem:[%s2443_s19 + $0x38] sm:$0xff] %v1550_v56  }
 0x20d   : > { %1594 = vst [vmem:[%s2443_s19 + $0x18] sm:$0xff] %v1530_v20  }
 0x210   : > { %v1298_v6 = vpop.f32.mrf.mxu3 }
 0x211   : > { %v1590_v49 = vpack.c.bf16 %v1298_v6, %v1295_v17 }
 0x213   : > { %1606 = vst [vmem:[%s2443_s19 + $0x78] sm:$0xff] %v1590_v49  }
 0x214   : > { %1771 = shalt.err (!%p1768_p8)
}
 0x215   : > { %s1816_s17 = smov 64   ;;  %s1817_s19 = smov 4  }
 0x216   : > { %1659 = dma.vmem_to_hbm [thread:$0]  (%p1891_p5), %s1379_s9, 2048, %s1381_s10, %s1366_s25, %s1816_s17, %s1816_s17, %s1817_s19  }
 0x217 PF: > { %p1671_p9 = scmp.ge.s32.totalorder %s1810_s24, 2  ;;  %s1395_s20 = sand.u32 1, %s1798_s21  }
 0x218   : > { %s1396_s26 = scalar_lea.sflag [#allocation4], %s1395_s20 }
 0x219   : > { %p1666_p10 = pnand %p1671_p9, %p1895_p6 }
 0x21b   : > { %p1667_p11 = pneg %p1666_p10 }
 0x21d   : > { %1793 = dma.done.wait (%p1667_p11), %s1396_s26, 2048  }
 0x21e   : > { %1795 = vsyncadd (%p1667_p11), %s1396_s26, 4294965248  ;;  %p17_p12 = scmp.ge.s32.totalorder %s1878_s27, 4   ;;  %s2510_s21 = smov %s1802_s22 }
 0x21f   : > { %s2511_s22 = smov %s1806_s23  ;;  %s2512_s23 = smov %s1889_s30 }
 0x220   : > { %s2513_s24 = smov %s1878_s27  ;;  %19 = sbr.rel (!%p17_p12) target bundleno = 4 (0x4), region = 93 }
 0x225   :  { %1402 = vsyncpa [#allocation3], 1 }
 0x226   :  { %1404 = vsyncpa [#allocation3 + $0x1], 1 }
 0x227   :  { %1405 = vsyncpa [#allocation4], 1 }
 0x228   :  { %1407 = vsyncpa [#allocation4 + $0x1], 1 }

</bundles_post_ra>
